<compile_context>
chip_gen: v6e
topology: v6e:2x2x1
jax: 0.10.0
libtpu: 0.0.40
codegen_flags: <defaults>
</compile_context>

<pallas_src>
import math
from functools import partial

import numpy as np

import jax
import jax.numpy as jnp
from jax.experimental import pallas as pl
from jax.experimental.pallas import tpu as pltpu

_SUBLANE = 8


def _round_up(v, m):
    return (v + m - 1) // m * m


def _score_gate_kernel(x_ref, wn_ref, xg_ref, s_ref):
    x = x_ref[...].astype(jnp.float32)                      # [TILE_N, C]
    wn = wn_ref[...]                                        # [1, C], pre-normalized f32
    s = jnp.tanh(jnp.sum(x * wn, axis=-1, keepdims=True))   # [TILE_N, 1]  (VPU mul + XLU reduce + EUP tanh)
    xg_ref[...] = (x * s).astype(xg_ref.dtype)              # lane-dense gated store, source dtype
    s_ref[...] = s


def _choose_tile_n(n, c, itemsize):
    # Budget: double-buffered x-in + xg-out tiles plus f32 working copies,
    # kept under ~12 MiB so the default scoped VMEM works on v5e/v6e/v7x.
    budget = 12 * 1024 * 1024
    per_row = c * (4 * itemsize + 8) + 32
    cap = max(_SUBLANE, (budget // per_row) // _SUBLANE * _SUBLANE)
    return max(_SUBLANE, min(1024, _round_up(n, _SUBLANE), cap))


def topk_score_gate(x, w):
    """Fused Pallas kernel: per-node tanh projection score + score-gated features."""
    n, c = x.shape

    # Pre-normalize the projection weight once (hoisted out of the kernel).
    w32 = w.reshape(1, c).astype(jnp.float32)
    wn = w32 * jax.lax.rsqrt(jnp.sum(w32 * w32, axis=-1, keepdims=True))

    tile_n = _choose_tile_n(n, c, x.dtype.itemsize)
    grid = (pl.cdiv(n, tile_n),)

    xg, s = pl.pallas_call(
        _score_gate_kernel,
        out_shape=(
            jax.ShapeDtypeStruct((n, c), x.dtype),
            jax.ShapeDtypeStruct((n, 1), jnp.float32),
        ),
        grid=grid,
        in_specs=[
            pl.BlockSpec((tile_n, c), lambda i: (i, 0)),   # x tile (channel block = full dim)
            pl.BlockSpec((1, c), lambda i: (0, 0)),        # normalized weight, resident
        ],
        out_specs=(
            pl.BlockSpec((tile_n, c), lambda i: (i, 0)),
            pl.BlockSpec((tile_n, 1), lambda i: (i, 0)),
        ),
        compiler_params=pltpu.CompilerParams(dimension_semantics=("parallel",)),
    )(x, wn)

    return xg, s[:, 0]


@partial(jax.jit, static_argnames=("k",))
def _topk_pool_core(x, edge_index, w, k):
    n = x.shape[0]
    e = edge_index.shape[1]

    gated_x, score = topk_score_gate(x, w)

    # TODO(synk): top-k node selection (sort) has no clean Pallas equivalent; plain JAX.
    _, perm = jax.lax.top_k(score, k)
    x_out = jnp.take(gated_x, perm, axis=0)

    # filter_adj: keep edges whose both endpoints survive, remap to new node ids.
    new_id = jnp.full((n,), -1, jnp.int32).at[perm].set(jnp.arange(k, dtype=jnp.int32))
    row = new_id[edge_index[0]]
    col = new_id[edge_index[1]]
    keep = (row >= 0) & (col >= 0)
    n_keep = jnp.sum(keep.astype(jnp.int32))

    # Bounded-size device-side compaction (kept edges packed to the front).
    pos = jnp.nonzero(keep, size=e, fill_value=e)[0]
    row_p = jnp.take(row, pos, mode="fill", fill_value=0)
    col_p = jnp.take(col, pos, mode="fill", fill_value=0)
    edge_packed = jnp.stack([row_p, col_p], axis=0)
    return x_out, edge_packed, n_keep


def topk_pooling_forward(x, edge_index, w, ratio):
    """Matches TopKPoolingLayer.forward: returns (pooled x, filtered/remapped edge_index)."""
    n = x.shape[0]
    k = int(math.ceil(ratio * n))
    x_out, edge_packed, n_keep = _topk_pool_core(x, edge_index, w, k)
    # TODO(synk): dynamic edge count needs one host sync for the final variable-size slice.
    e_keep = int(n_keep)
    return x_out, edge_packed[:, :e_keep]


if __name__ == "__main__":
    key = jax.random.PRNGKey(0)
    nodes_in, nodes_out, channels_out = 16, 8, 4
    ratio = nodes_out / nodes_in

    kx, kw = jax.random.split(key)
    x = jax.random.normal(kx, (nodes_in, channels_out), jnp.float32)
    w = jax.random.normal(kw, (1, channels_out), jnp.float32)  # TopKPooling projection weight

    # Deterministic small graph: bidirectional ring over 16 nodes (32 edges).
    idx = jnp.arange(nodes_in, dtype=jnp.int32)
    nxt = (idx + 1) % nodes_in
    edge_index = jnp.stack(
        [jnp.concatenate([idx, nxt]), jnp.concatenate([nxt, idx])], axis=0
    )

    x_out, ei_out = topk_pooling_forward(x, edge_index, w, ratio)
    x_out = jax.block_until_ready(x_out)
    ei_out = jax.block_until_ready(ei_out)

    # Pure numpy reference of the same TopKPooling math.
    x_np = np.asarray(x)
    w_np = np.asarray(w)
    score_ref = np.tanh((x_np * w_np).sum(-1) / np.linalg.norm(w_np))
    k = int(math.ceil(ratio * nodes_in))
    perm_ref = np.argsort(-score_ref, kind="stable")[:k]
    x_ref = x_np[perm_ref] * score_ref[perm_ref][:, None]

    new_id_ref = np.full((nodes_in,), -1, np.int64)
    new_id_ref[perm_ref] = np.arange(k)
    ei_np = np.asarray(edge_index)
    r, c = new_id_ref[ei_np[0]], new_id_ref[ei_np[1]]
    m = (r >= 0) & (c >= 0)
    ei_ref = np.stack([r[m], c[m]], axis=0)

    assert x_out.shape == (k, channels_out)
    assert x_out.dtype == x.dtype
    assert np.allclose(np.asarray(x_out), x_ref, atol=1e-5, rtol=1e-5)
    assert np.array_equal(np.asarray(ei_out), ei_ref)

    print("KERNEL_OK")
</pallas_src>

<mosaic_0001>
module attributes {stable_mosaic.version = 11 : i64} {
  func.func private @main(%arg0: i32) attributes {dimension_semantics = [#tpu.dimension_semantics<core_parallel>], iteration_bounds = array<i64: 2>, tpu.core_type = #tpu.core_type<sc_scalar_subcore>, window_params = []} {
    return
  }
}

module attributes {stable_mosaic.version = 11 : i64} {
  func.func private @main(%arg0: i32) attributes {dimension_semantics = [#tpu.dimension_semantics<core_parallel>], iteration_bounds = array<i64: 2>, tpu.core_type = #tpu.core_type<sc_scalar_subcore>, window_params = []} {
    return
  }
}

module attributes {stable_mosaic.version = 11 : i64} {
  func.func @_score_gate_kernel(%arg0: i32, %arg1: memref<16x4xf32, #tpu.memory_space<vmem>>, %arg2: memref<1x4xf32, #tpu.memory_space<vmem>>, %arg3: memref<16x4xf32, #tpu.memory_space<vmem>>, %arg4: memref<16x1xf32, #tpu.memory_space<vmem>>) attributes {dimension_semantics = [#tpu.dimension_semantics<parallel>], iteration_bounds = array<i64: 1>, scalar_prefetch = 0 : i64, scratch_operands = 0 : i64, tpu.core_type = #tpu.core_type<tc>, window_params = [{transform_indices = @transform_0, window_bounds = array<i64: 16, 4>}, {pipeline_mode = #tpu.pipeline_mode<synchronous>, transform_indices = @transform_1, window_bounds = array<i64: 1, 4>}, {transform_indices = @transform_2, window_bounds = array<i64: 16, 4>}, {transform_indices = @transform_3, window_bounds = array<i64: 16, 1>}]} {
    %c0 = arith.constant 0 : index
    %c0_0 = arith.constant 0 : index
    %0 = vector.load %arg1[%c0, %c0_0] : memref<16x4xf32, #tpu.memory_space<vmem>>, vector<16x4xf32>
    %c0_1 = arith.constant 0 : index
    %c0_2 = arith.constant 0 : index
    %1 = vector.load %arg2[%c0_1, %c0_2] : memref<1x4xf32, #tpu.memory_space<vmem>>, vector<1x4xf32>
    %2 = vector.broadcast %1 : vector<1x4xf32> to vector<16x4xf32>
    %3 = arith.mulf %0, %2 : vector<16x4xf32>
    %cst = arith.constant dense<0.000000e+00> : vector<16xf32>
    %4 = vector.multi_reduction <add>, %3, %cst [1] : vector<16x4xf32> to vector<16xf32>
    %5 = vector.shape_cast %4 : vector<16xf32> to vector<16x1xf32>
    %6 = math.tanh %5 : vector<16x1xf32>
    %7 = vector.broadcast %6 : vector<16x1xf32> to vector<16x4xf32>
    %8 = arith.mulf %0, %7 : vector<16x4xf32>
    %c0_3 = arith.constant 0 : index
    %c0_4 = arith.constant 0 : index
    %9 = vector.load %arg3[%c0_3, %c0_4] : memref<16x4xf32, #tpu.memory_space<vmem>>, vector<16x4xf32>
    tpu.vector_store %arg3[%c0_3, %c0_4], %8 {strides = array<i32>} : memref<16x4xf32, #tpu.memory_space<vmem>>, vector<16x4xf32>,
    %c0_5 = arith.constant 0 : index
    %c0_6 = arith.constant 0 : index
    %10 = vector.load %arg4[%c0_5, %c0_6] : memref<16x1xf32, #tpu.memory_space<vmem>>, vector<16x1xf32>
    tpu.vector_store %arg4[%c0_5, %c0_6], %6 {strides = array<i32>} : memref<16x1xf32, #tpu.memory_space<vmem>>, vector<16x1xf32>,
    return
  }
  func.func @transform_0(%arg0: i32) -> (i32, i32) {
    %c0_i32 = arith.constant 0 : i32
    %c0_i32_0 = arith.constant 0 : i32
    return %arg0, %c0_i32 : i32, i32
  }
  func.func @transform_1(%arg0: i32) -> (i32, i32) {
    %c0_i32 = arith.constant 0 : i32
    %c0_i32_0 = arith.constant 0 : i32
    %c0_i32_1 = arith.constant 0 : i32
    return %c0_i32, %c0_i32_0 : i32, i32
  }
  func.func @transform_2(%arg0: i32) -> (i32, i32) {
    %c0_i32 = arith.constant 0 : i32
    %c0_i32_0 = arith.constant 0 : i32
    return %arg0, %c0_i32 : i32, i32
  }
  func.func @transform_3(%arg0: i32) -> (i32, i32) {
    %c0_i32 = arith.constant 0 : i32
    %c0_i32_0 = arith.constant 0 : i32
    return %arg0, %c0_i32 : i32, i32
  }
}

</mosaic_0001>

<bundles_post_ra>
// kernel: _topk_pool_core.1
= control target key start
LH: loop header
LB: loop body
LE: loop exit
PB: predicated region body
PF: predicated region fallthrough
CT: control target
= control target key end

     0   :  { %vm24_vm0 = vcmask 31744   ;;  %vm37_vm1 = vcmask 7168   ;;  %s98_s0 = inlined_call_operand.vmem [shape: f32[16,4], index: 0, kind: input, shape index: {}]   ;;  %s99_s1 = inlined_call_operand.vmem [shape: f32[1,4], index: 1, kind: input, shape index: {}]   ;;  %s100_s3 = inlined_call_operand.vmem [shape: f32[16,1], index: 3, kind: output, shape index: {1}]   ;;  %s101_s2 = inlined_call_operand.vmem [shape: f32[16,4], index: 2, kind: output, shape index: {0}]  }
   0x1   :  { %v13_v0 = vld [vmem:[%s98_s0] sm:$0xff]  ;;  %v14_v2 = vld [vmem:[%s98_s0 + $0x8] sm:$0xff] }
   0x2   :  { %v48_v1 = vld [vmem:[%s99_s1] ss:$0 sm:$0xff] }
   0x3   :  { %v22_v3 = vmul.f32 %v48_v1, %v13_v0  ;;  %v23_v4 = vmul.f32 %v48_v1, %v14_v2 }
   0x5   :  { %v25_v5 = vsel %vm24_vm0, %v22_v3, 0.0  ;;  %v28_v6 = vsel %vm24_vm0, %v23_v4, 0.0 }
   0x6   :  { %26 = vadd.xlane.f32.xlu0 %v25_v5 }
   0xa   :  { %29 = vadd.xlane.f32.xlu0 %v28_v6 }
  0x8f   :  { %v27_v7 = vpop.xlane.xlu0 %26 }
  0x90   :  { %49 = vtanh.f32 %v27_v7 }
  0x93   :  { %v30_v8 = vpop.xlane.xlu0 %29 }
  0x94   :  { %51 = vtanh.f32 %v30_v8 }
  0x9d   :  { %v50_v9 = vpop.eup %49 }
  0x9e   :  { %v33_v10 = vmul.f32 %v50_v9, %v13_v0  ;;  %38 = vst.msk [vmem:[%s100_s3] sm:$0xff] %vm37_vm1, %v50_v9 }
  0xa0   :  { %35 = vst.msk [vmem:[%s101_s2] sm:$0xff] %vm24_vm0, %v33_v10 }
  0xa1   :  { %v52_v11 = vpop.eup %51 }
  0xa2   :  { %v34_v12 = vmul.f32 %v52_v11, %v14_v2  ;;  %39 = vst.msk [vmem:[%s100_s3 + $0x8] sm:$0xff] %vm37_vm1, %v52_v11 }
  0xa4   :  { %36 = vst.msk [vmem:[%s101_s2 + $0x8] sm:$0xff] %vm24_vm0, %v34_v12 }

</bundles_post_ra>
